<compile_context>
chip_gen: v5e
topology: v5e:2x2
jax: 0.10.0
libtpu: 0.0.40
codegen_flags: <defaults>
</compile_context>

<pallas_src>
import functools
import math

import jax
import jax.numpy as jnp
from jax.experimental import pallas as pl
from jax.experimental.pallas import tpu as pltpu


HIDDEN = 128
MAX_TILE_B = 4096


# ----------------------------------------------------------------------------
# Kernel: whole 3-layer MLP for one batch tile. Weights are VMEM-resident.
# ----------------------------------------------------------------------------
def noisy_mlp_kernel(
    x_ref,    # (TILE_B, in_dim)       compute dtype (f32 or bf16)
    w1_ref,   # (in_dim, 128)          feature layer          (compute dtype)
    b1_ref,   # (1, 128)               f32
    w2_ref,   # (128, 128)             noisy_layer1 effective (compute dtype)
    b2_ref,   # (1, 128)               f32
    w3_ref,   # (128, out_dim)         noisy_layer2 effective (compute dtype)
    b3_ref,   # (1, out_dim)           f32
    o_ref,    # (TILE_B, out_dim)      f32
):
    cdt = w1_ref.dtype  # matmul-operand dtype; accumulation is always f32.

    h = jnp.dot(x_ref[...], w1_ref[...], preferred_element_type=jnp.float32)
    h = jnp.maximum(h + b1_ref[...], 0.0)              # f32 elementwise (v5e-safe)

    h = jnp.dot(h.astype(cdt), w2_ref[...], preferred_element_type=jnp.float32)
    h = jnp.maximum(h + b2_ref[...], 0.0)

    out = jnp.dot(h.astype(cdt), w3_ref[...], preferred_element_type=jnp.float32)
    o_ref[...] = (out + b3_ref[...]).astype(o_ref.dtype)


# ----------------------------------------------------------------------------
# Tiling helpers.
# ----------------------------------------------------------------------------
def _cdiv(a, b):
    return -(-a // b)


def _round_up(n, m):
    return _cdiv(n, m) * m


def _vmem_capacity_bytes():
    """Physical VMEM of the local chip; conservative (v7x-sized) fallback."""
    try:
        return int(pltpu.get_tpu_info().vmem_capacity_bytes)
    except Exception:
        return 64 * 1024 * 1024


def _choose_grid(batch, max_tile, align):
    """Pick (tile_b, n_tiles) so padding waste is tiny and v7x gets >=2 tiles."""
    n = _cdiv(batch, max_tile)
    # Megacore: never leave a second v7x TensorCore idle on a sizeable batch.
    if batch >= 256 and n < 2:
        n = 2
    tile_b = _round_up(_cdiv(batch, n), align)
    n = _cdiv(batch, tile_b)
    return tile_b, n


def _resident(arr):
    """Full-array block with constant index_map -> stays in VMEM across steps."""
    return pl.BlockSpec(arr.shape, lambda i: (0, 0))


# ----------------------------------------------------------------------------
# Wrapper: batch grid + resident weights + unpadded contiguous output.
# ----------------------------------------------------------------------------
@functools.partial(jax.jit, static_argnames=("compute_dtype",))
def noisy_linear_forward(x, params, compute_dtype="float32"):
    cdt = jnp.dtype(compute_dtype)
    B, in_dim = x.shape
    out_dim = params["w3"].shape[1]

    # Matmul operands in compute dtype; biases (and all elementwise) stay f32.
    x_c = x.astype(cdt)
    w1_c = params["w1"].astype(cdt)
    w2_c = params["w2"].astype(cdt)
    w3_c = params["w3"].astype(cdt)
    b1_f = params["b1"].astype(jnp.float32)
    b2_f = params["b2"].astype(jnp.float32)
    b3_f = params["b3"].astype(jnp.float32)

    weight_bytes = sum(a.size * a.dtype.itemsize
                       for a in (w1_c, b1_f, w2_c, b2_f, w3_c, b3_f))

    # ---- VMEM-budget-driven batch tile --------------------------------------
    vmem_cap = _vmem_capacity_bytes()
    # Per-row VMEM cost of the pipelined arrays + intermediates:
    #   2x x-tile double buffer, 2x out-tile double buffer, two f32 activations.
    per_row = (2 * in_dim * cdt.itemsize
               + 2 * out_dim * 4
               + 2 * HIDDEN * 4)
    budget = max(1 << 20, int(vmem_cap * 0.45) - 2 * weight_bytes)
    sublane_align = max(8, 32 // cdt.itemsize)       # 8 for f32, 16 for bf16
    max_tile = max(sublane_align,
                   min(MAX_TILE_B, (budget // per_row) // sublane_align * sublane_align))

    tile_b, n_tiles = _choose_grid(B, max_tile, sublane_align)
    b_pad = tile_b * n_tiles
    if b_pad != B:
        # Padding waste is <= ~sublane_align rows per tile (tiny), and the rows
        # are sliced off after the kernel.
        x_c = jnp.pad(x_c, ((0, b_pad - B), (0, 0)))

    per_step_bytes = tile_b * per_row + 2 * weight_bytes
    vmem_limit = int(min(vmem_cap * 9 // 10,
                         max(2 * per_step_bytes, 32 * 1024 * 1024)))

    flops = 2 * b_pad * (in_dim * HIDDEN + HIDDEN * HIDDEN + HIDDEN * out_dim)
    bytes_accessed = (b_pad * in_dim * cdt.itemsize
                      + b_pad * out_dim * 4
                      + weight_bytes)

    q = pl.pallas_call(
        noisy_mlp_kernel,
        out_shape=jax.ShapeDtypeStruct((b_pad, out_dim), jnp.float32),
        grid_spec=pltpu.PrefetchScalarGridSpec(
            num_scalar_prefetch=0,
            grid=(n_tiles,),
            in_specs=[
                pl.BlockSpec((tile_b, in_dim), lambda i: (i, 0)),   # x tiles
                _resident(w1_c), _resident(b1_f),
                _resident(w2_c), _resident(b2_f),
                _resident(w3_c), _resident(b3_f),
            ],
            # Unpadded output block: last dim == full array dim (legal), so we
            # only write out_dim columns to HBM (no lane-pad write amplification)
            # and the DMA is still contiguous for a row-major (B, out_dim) array.
            out_specs=pl.BlockSpec((tile_b, out_dim), lambda i: (i, 0)),
        ),
        compiler_params=pltpu.CompilerParams(
            dimension_semantics=("parallel",),   # megacore sharding on v7x
            vmem_limit_bytes=vmem_limit,
        ),
        cost_estimate=pl.CostEstimate(
            flops=flops, transcendentals=0, bytes_accessed=bytes_accessed),
    )(x_c, w1_c, b1_f, w2_c, b2_f, w3_c, b3_f)

    return q[:B]


# ----------------------------------------------------------------------------
# Deterministic parameter construction (mirrors the PyTorch __init__ /
# reset_parameters / reset_noise, with the noise folded into effective W, b).
# ----------------------------------------------------------------------------
def _scale_noise(key, size):
    """Factorized gaussian noise: sign(x) * sqrt(|x|)."""
    x = jax.random.normal(key, (size,), dtype=jnp.float32)
    return jnp.sign(x) * jnp.sqrt(jnp.abs(x))


def _noisy_linear_params(key, in_features, out_features, std_init=0.5):
    """Effective (mu + sigma*eps) weight/bias, transposed to (in, out)/(1, out)."""
    k_mu_w, k_mu_b, k_eps_in, k_eps_out = jax.random.split(key, 4)
    mu_range = 1.0 / math.sqrt(in_features)

    weight_mu = jax.random.uniform(
        k_mu_w, (out_features, in_features), jnp.float32, -mu_range, mu_range)
    weight_sigma = jnp.full((out_features, in_features),
                            std_init / math.sqrt(in_features), jnp.float32)
    bias_mu = jax.random.uniform(
        k_mu_b, (out_features,), jnp.float32, -mu_range, mu_range)
    bias_sigma = jnp.full((out_features,),
                          std_init / math.sqrt(out_features), jnp.float32)

    eps_in = _scale_noise(k_eps_in, in_features)
    eps_out = _scale_noise(k_eps_out, out_features)

    w_eff = weight_mu + weight_sigma * jnp.outer(eps_out, eps_in)   # (out, in)
    b_eff = bias_mu + bias_sigma * eps_out                          # (out,)
    return w_eff.T, b_eff.reshape(1, out_features)


def make_params(key, in_dim, out_dim):
    k_fw, k_fb, k_n1, k_n2 = jax.random.split(key, 4)

    # nn.Linear(in_dim, 128): uniform(-1/sqrt(in_dim), 1/sqrt(in_dim)).
    bound = 1.0 / math.sqrt(in_dim)
    w1 = jax.random.uniform(k_fw, (in_dim, HIDDEN), jnp.float32, -bound, bound)
    b1 = jax.random.uniform(k_fb, (1, HIDDEN), jnp.float32, -bound, bound)

    w2, b2 = _noisy_linear_params(k_n1, HIDDEN, HIDDEN)
    w3, b3 = _noisy_linear_params(k_n2, HIDDEN, out_dim)

    return {"w1": w1, "b1": b1, "w2": w2, "b2": b2, "w3": w3, "b3": b3}


# Pure-JAX reference for correctness checking.
def noisy_linear_reference(x, p):
    feat = jnp.maximum(x @ p["w1"] + p["b1"], 0.0)
    hidden = jnp.maximum(feat @ p["w2"] + p["b2"], 0.0)
    return hidden @ p["w3"] + p["b3"]


if __name__ == "__main__":
    key = jax.random.PRNGKey(0)
    k_x, k_x2, k_p = jax.random.split(key, 3)

    batch, in_dim, out_dim = 8, 16, 8
    params = make_params(k_p, in_dim, out_dim)

    # Small-shape check (single tile, grid=1), f32 path, exact parity.
    x = jax.random.normal(k_x, (batch, in_dim), dtype=jnp.float32)
    q = jax.block_until_ready(noisy_linear_forward(x, params))
    assert q.shape == (batch, out_dim)
    assert jnp.allclose(q, noisy_linear_reference(x, params), atol=1e-5, rtol=1e-5)

    # Gridded / padding-aware path: B=600 -> 2 parallel tiles (pads to ~608).
    x_big = jax.random.normal(k_x2, (600, in_dim), dtype=jnp.float32)
    q_big = jax.block_until_ready(noisy_linear_forward(x_big, params))
    assert q_big.shape == (600, out_dim)
    assert jnp.allclose(q_big, noisy_linear_reference(x_big, params),
                        atol=1e-5, rtol=1e-5)

    # Optional bf16 matmul-operand path (f32 accumulation, f32 bias/ReLU):
    # MXU-peak path for v6e/v7x; looser tolerance as expected for bf16.
    q_bf16 = jax.block_until_ready(
        noisy_linear_forward(x_big, params, compute_dtype="bfloat16"))
    assert q_bf16.shape == (600, out_dim)
    assert jnp.allclose(q_bf16, noisy_linear_reference(x_big, params),
                        atol=5e-2, rtol=5e-2)

    print("KERNEL_OK")
</pallas_src>

<mosaic_0001>
module attributes {stable_mosaic.version = 11 : i64} {
  func.func @noisy_mlp_kernel(%arg0: i32, %arg1: memref<8x16xf32, #tpu.memory_space<vmem>>, %arg2: memref<16x128xf32, #tpu.memory_space<vmem>>, %arg3: memref<1x128xf32, #tpu.memory_space<vmem>>, %arg4: memref<128x128xf32, #tpu.memory_space<vmem>>, %arg5: memref<1x128xf32, #tpu.memory_space<vmem>>, %arg6: memref<128x8xf32, #tpu.memory_space<vmem>>, %arg7: memref<1x8xf32, #tpu.memory_space<vmem>>, %arg8: memref<8x8xf32, #tpu.memory_space<vmem>>) attributes {dimension_semantics = [#tpu.dimension_semantics<parallel>], iteration_bounds = array<i64: 1>, scalar_prefetch = 0 : i64, scratch_operands = 0 : i64, tpu.core_type = #tpu.core_type<tc>, window_params = [{transform_indices = @transform_0, window_bounds = array<i64: 8, 16>}, {pipeline_mode = #tpu.pipeline_mode<synchronous>, transform_indices = @transform_1, window_bounds = array<i64: 16, 128>}, {pipeline_mode = #tpu.pipeline_mode<synchronous>, transform_indices = @transform_2, window_bounds = array<i64: 1, 128>}, {pipeline_mode = #tpu.pipeline_mode<synchronous>, transform_indices = @transform_3, window_bounds = array<i64: 128, 128>}, {pipeline_mode = #tpu.pipeline_mode<synchronous>, transform_indices = @transform_4, window_bounds = array<i64: 1, 128>}, {pipeline_mode = #tpu.pipeline_mode<synchronous>, transform_indices = @transform_5, window_bounds = array<i64: 128, 8>}, {pipeline_mode = #tpu.pipeline_mode<synchronous>, transform_indices = @transform_6, window_bounds = array<i64: 1, 8>}, {transform_indices = @transform_7, window_bounds = array<i64: 8, 8>}]} {
    %c0 = arith.constant 0 : index
    %c0_0 = arith.constant 0 : index
    %0 = vector.load %arg1[%c0, %c0_0] : memref<8x16xf32, #tpu.memory_space<vmem>>, vector<8x16xf32>
    %c0_1 = arith.constant 0 : index
    %c0_2 = arith.constant 0 : index
    %1 = vector.load %arg2[%c0_1, %c0_2] : memref<16x128xf32, #tpu.memory_space<vmem>>, vector<16x128xf32>
    %cst = arith.constant dense<0.000000e+00> : vector<8x128xf32>
    %2 = tpu.matmul %0, %1, %cst {dimension_numbers = #tpu.dot_dimension_numbers<[1], [0], [0], [1], [0, 0, 1, 1], [], []>} : vector<8x16xf32>, vector<16x128xf32>, vector<8x128xf32> -> vector<8x128xf32>
    %c0_3 = arith.constant 0 : index
    %c0_4 = arith.constant 0 : index
    %3 = vector.load %arg3[%c0_3, %c0_4] : memref<1x128xf32, #tpu.memory_space<vmem>>, vector<1x128xf32>
    %4 = vector.broadcast %3 : vector<1x128xf32> to vector<8x128xf32>
    %5 = arith.addf %2, %4 : vector<8x128xf32>
    %cst_5 = arith.constant 0.000000e+00 : f32
    %6 = vector.broadcast %cst_5 : f32 to vector<8x128xf32>
    %7 = arith.maximumf %5, %6 : vector<8x128xf32>
    %c0_6 = arith.constant 0 : index
    %c0_7 = arith.constant 0 : index
    %8 = vector.load %arg4[%c0_6, %c0_7] : memref<128x128xf32, #tpu.memory_space<vmem>>, vector<128x128xf32>
    %cst_8 = arith.constant dense<0.000000e+00> : vector<8x128xf32>
    %9 = tpu.matmul %7, %8, %cst_8 {dimension_numbers = #tpu.dot_dimension_numbers<[1], [0], [0], [1], [0, 0, 1, 1], [], []>} : vector<8x128xf32>, vector<128x128xf32>, vector<8x128xf32> -> vector<8x128xf32>
    %c0_9 = arith.constant 0 : index
    %c0_10 = arith.constant 0 : index
    %10 = vector.load %arg5[%c0_9, %c0_10] : memref<1x128xf32, #tpu.memory_space<vmem>>, vector<1x128xf32>
    %11 = vector.broadcast %10 : vector<1x128xf32> to vector<8x128xf32>
    %12 = arith.addf %9, %11 : vector<8x128xf32>
    %cst_11 = arith.constant 0.000000e+00 : f32
    %13 = vector.broadcast %cst_11 : f32 to vector<8x128xf32>
    %14 = arith.maximumf %12, %13 : vector<8x128xf32>
    %c0_12 = arith.constant 0 : index
    %c0_13 = arith.constant 0 : index
    %15 = vector.load %arg6[%c0_12, %c0_13] : memref<128x8xf32, #tpu.memory_space<vmem>>, vector<128x8xf32>
    %cst_14 = arith.constant dense<0.000000e+00> : vector<8x8xf32>
    %16 = tpu.matmul %14, %15, %cst_14 {dimension_numbers = #tpu.dot_dimension_numbers<[1], [0], [0], [1], [0, 0, 1, 1], [], []>} : vector<8x128xf32>, vector<128x8xf32>, vector<8x8xf32> -> vector<8x8xf32>
    %c0_15 = arith.constant 0 : index
    %c0_16 = arith.constant 0 : index
    %17 = vector.load %arg7[%c0_15, %c0_16] : memref<1x8xf32, #tpu.memory_space<vmem>>, vector<1x8xf32>
    %18 = vector.broadcast %17 : vector<1x8xf32> to vector<8x8xf32>
    %19 = arith.addf %16, %18 : vector<8x8xf32>
    %c0_17 = arith.constant 0 : index
    %c0_18 = arith.constant 0 : index
    %20 = vector.load %arg8[%c0_17, %c0_18] : memref<8x8xf32, #tpu.memory_space<vmem>>, vector<8x8xf32>
    tpu.vector_store %arg8[%c0_17, %c0_18], %19 {strides = array<i32>} : memref<8x8xf32, #tpu.memory_space<vmem>>, vector<8x8xf32>,
    return
  }
  func.func @transform_0(%arg0: i32) -> (i32, i32) {
    %c0_i32 = arith.constant 0 : i32
    %c0_i32_0 = arith.constant 0 : i32
    return %arg0, %c0_i32 : i32, i32
  }
  func.func @transform_1(%arg0: i32) -> (i32, i32) {
    %c0_i32 = arith.constant 0 : i32
    %c0_i32_0 = arith.constant 0 : i32
    %c0_i32_1 = arith.constant 0 : i32
    return %c0_i32, %c0_i32_0 : i32, i32
  }
  func.func @transform_2(%arg0: i32) -> (i32, i32) {
    %c0_i32 = arith.constant 0 : i32
    %c0_i32_0 = arith.constant 0 : i32
    %c0_i32_1 = arith.constant 0 : i32
    return %c0_i32, %c0_i32_0 : i32, i32
  }
  func.func @transform_3(%arg0: i32) -> (i32, i32) {
    %c0_i32 = arith.constant 0 : i32
    %c0_i32_0 = arith.constant 0 : i32
    %c0_i32_1 = arith.constant 0 : i32
    return %c0_i32, %c0_i32_0 : i32, i32
  }
  func.func @transform_4(%arg0: i32) -> (i32, i32) {
    %c0_i32 = arith.constant 0 : i32
    %c0_i32_0 = arith.constant 0 : i32
    %c0_i32_1 = arith.constant 0 : i32
    return %c0_i32, %c0_i32_0 : i32, i32
  }
  func.func @transform_5(%arg0: i32) -> (i32, i32) {
    %c0_i32 = arith.constant 0 : i32
    %c0_i32_0 = arith.constant 0 : i32
    %c0_i32_1 = arith.constant 0 : i32
    return %c0_i32, %c0_i32_0 : i32, i32
  }
  func.func @transform_6(%arg0: i32) -> (i32, i32) {
    %c0_i32 = arith.constant 0 : i32
    %c0_i32_0 = arith.constant 0 : i32
    %c0_i32_1 = arith.constant 0 : i32
    return %c0_i32, %c0_i32_0 : i32, i32
  }
  func.func @transform_7(%arg0: i32) -> (i32, i32) {
    %c0_i32 = arith.constant 0 : i32
    %c0_i32_0 = arith.constant 0 : i32
    return %arg0, %c0_i32 : i32, i32
  }
}

</mosaic_0001>

<bundles_post_ra>
// kernel: noisy_linear_forward.1
= control target key start
LH: loop header
LB: loop body
LE: loop exit
PB: predicated region body
PF: predicated region fallthrough
CT: control target
= control target key end

     0   :  { %12 = vsyncpa [#allocation3], 0  ;;  %s393_s0 = inlined_call_operand.vmem [shape: f32[8,16], index: 0, kind: input, shape index: {}]   ;;  %s394_s1 = inlined_call_operand.hbm [shape: f32[16,128], index: 1, kind: input, shape index: {}]   ;;  %s395_s2 = inlined_call_operand.vmem [shape: f32[1,128], index: 2, kind: input, shape index: {}]   ;;  %s396_s3 = inlined_call_operand.vmem [shape: f32[128,128], index: 3, kind: input, shape index: {}]   ;;  %s397_s4 = inlined_call_operand.vmem [shape: f32[1,128], index: 4, kind: input, shape index: {}]   ;;  %s398_s5 = inlined_call_operand.vmem [shape: f32[128,8], index: 5, kind: input, shape index: {}]   ;;  %s399_s6 = inlined_call_operand.vmem [shape: f32[1,8], index: 6, kind: input, shape index: {}]   ;;  %s400_s7 = inlined_call_operand.hbm [shape: f32[8,8], index: 7, kind: output, shape index: {}]  }
   0x1   :  { %13 = vsyncpa [#allocation4], 0  ;;  %s20_s26 = sshll.u32 %s394_s1, 4  ;;  %s235_s27 = smov [#allocation2]   ;;  %s21_s26 = int_to_ptr.hbm [resolvable:$true] %s20_s26 }
   0x2   :  { %s22_s28 = sshll.u32 %s235_s27, 4  ;;  %s236_s29 = smov 128   ;;  %s23_s28 = int_to_ptr.vmem [resolvable:$true] %s22_s28 }
   0x3   :  { %s237_s30 = smov 8  }
   0x4   :  { %28 = dma.hbm_to_vmem [thread:$0]  %s21_s26, 256, %s23_s28, [#allocation3], %s236_s29, %s236_s29, %s237_s30  }
   0x5   :  { %231 = dma.done.wait [#allocation3], 256  }
   0x6   :  { %232 = vsyncadd [#allocation3], 4294967040  ;;  %v45_v0 = vld [vmem:[#allocation2 + $0x8] sm:$0xff]  ;;  %v44_v1 = vld [vmem:[#allocation2] sm:$0xff]  ;;  %vm50_vm0 = vcmask 130048   ;;  %s238_s25 = smov [#allocation5]  }
   0x7   :  { %68 = vmatpush.msra.mxu0 %v45_v0  ;;  %v43_v2 = vld [vmem:[%s393_s0] sm:$0xff]  ;;  %v90_v3 = vld [vmem:[%s396_s3 + $0x78] sm:$0xff]  ;;  %v89_v4 = vld [vmem:[%s396_s3 + $0x70] sm:$0xff]  ;;  %s163_s26 = sshll.u32 %s238_s25, 4  ;;  %s165_s29 = sshll.u32 %s400_s7, 4  ;;  %vm156_vm1 = vcmask 64512   ;;  %s164_s26 = int_to_ptr.vmem [resolvable:$true] %s163_s26  ;;  %s166_s29 = int_to_ptr.hbm [resolvable:$true] %s165_s29 }
   0x8   :  { %95 = vmatpush.msra.mxu1 %v90_v3  ;;  %v88_v5 = vld [vmem:[%s396_s3 + $0x68] sm:$0xff]  ;;  %v87_v6 = vld [vmem:[%s396_s3 + $0x60] sm:$0xff]  ;;  %v86_v7 = vld [vmem:[%s396_s3 + $0x58] sm:$0xff] }
   0x9   :  { %69 = vmatpush.msra.mxu0 %v44_v1  ;;  %v85_v8 = vld [vmem:[%s396_s3 + $0x50] sm:$0xff]  ;;  %v84_v9 = vld [vmem:[%s396_s3 + $0x48] sm:$0xff]  ;;  %v83_v10 = vld [vmem:[%s396_s3 + $0x40] sm:$0xff] }
   0xa   :  { %175 = vmatmul.msk.f32.vlgmr.msra.gmra.mxu0 %vm50_vm0, %v43_v2  ;;  %96 = vmatpush.msra.mxu1 %v89_v4  ;;  %v82_v11 = vld [vmem:[%s396_s3 + $0x38] sm:$0xff]  ;;  %v81_v12 = vld [vmem:[%s396_s3 + $0x30] sm:$0xff]  ;;  %v80_v13 = vld [vmem:[%s396_s3 + $0x28] sm:$0xff] }
   0xb   :  { %v79_v14 = vld [vmem:[%s396_s3 + $0x20] sm:$0xff]  ;;  %v78_v15 = vld [vmem:[%s396_s3 + $0x18] sm:$0xff]  ;;  %v77_v16 = vld [vmem:[%s396_s3 + $0x10] sm:$0xff] }
   0xc   :  { %97 = vmatpush.msra.mxu1 %v88_v5  ;;  %v76_v17 = vld [vmem:[%s396_s3 + $0x8] sm:$0xff]  ;;  %v75_v18 = vld [vmem:[%s396_s3] sm:$0xff]  ;;  %v131_v19 = vld [vmem:[%s398_s5 + $0x78] sm:$0xff] }
   0xd   :  { %v130_v20 = vld [vmem:[%s398_s5 + $0x70] sm:$0xff]  ;;  %136 = vmatpush.msra.mxu2 %v131_v19  ;;  %v129_v21 = vld [vmem:[%s398_s5 + $0x68] sm:$0xff]  ;;  %v128_v22 = vld [vmem:[%s398_s5 + $0x60] sm:$0xff] }
   0xe   :  { %98 = vmatpush.msra.mxu1 %v87_v6  ;;  %v127_v23 = vld [vmem:[%s398_s5 + $0x58] sm:$0xff]  ;;  %v126_v24 = vld [vmem:[%s398_s5 + $0x50] sm:$0xff]  ;;  %v125_v25 = vld [vmem:[%s398_s5 + $0x48] sm:$0xff] }
   0xf   :  { %137 = vmatpush.msra.mxu2 %v130_v20  ;;  %v124_v26 = vld [vmem:[%s398_s5 + $0x40] sm:$0xff]  ;;  %v123_v27 = vld [vmem:[%s398_s5 + $0x38] sm:$0xff]  ;;  %v122_v28 = vld [vmem:[%s398_s5 + $0x30] sm:$0xff] }
  0x10   :  { %99 = vmatpush.msra.mxu1 %v86_v7  ;;  %v121_v29 = vld [vmem:[%s398_s5 + $0x28] sm:$0xff]  ;;  %v120_v30 = vld [vmem:[%s398_s5 + $0x20] sm:$0xff]  ;;  %v119_v31 = vld [vmem:[%s398_s5 + $0x18] sm:$0xff] }
  0x11   :  { %138 = vmatpush.msra.mxu2 %v129_v21  ;;  %v180_v32 = vld [vmem:[%s395_s2] ss:$0 sm:$0xff]  ;;  %v118_v36 = vld [vmem:[%s398_s5 + $0x10] sm:$0xff]  ;;  %v117_v37 = vld [vmem:[%s398_s5 + $0x8] sm:$0xff] }
  0x12   :  { %100 = vmatpush.msra.mxu1 %v85_v8  ;;  %v116_v38 = vld [vmem:[%s398_s5] sm:$0xff] }
  0x13   :  { %139 = vmatpush.msra.mxu2 %v128_v22  ;;  %v181_v39 = vld [vmem:[%s397_s4] ss:$0 sm:$0xff] }
  0x14   :  { %101 = vmatpush.msra.mxu1 %v84_v9  ;;  %v182_v43 = vld [vmem:[%s399_s6] ss:$0 sm:$0xff] }
  0x15   :  { %140 = vmatpush.msra.mxu2 %v127_v23 }
  0x16   :  { %102 = vmatpush.msra.mxu1 %v83_v10 }
  0x17   :  { %141 = vmatpush.msra.mxu2 %v126_v24 }
  0x18   :  { %103 = vmatpush.msra.mxu1 %v82_v11 }
  0x19   :  { %142 = vmatpush.msra.mxu2 %v125_v25 }
  0x1a   :  { %104 = vmatpush.msra.mxu1 %v81_v12 }
  0x1b   :  { %143 = vmatpush.msra.mxu2 %v124_v26 }
  0x1c   :  { %105 = vmatpush.msra.mxu1 %v80_v13 }
  0x1d   :  { %144 = vmatpush.msra.mxu2 %v123_v27 }
  0x1e   :  { %106 = vmatpush.msra.mxu1 %v79_v14 }
  0x1f   :  { %145 = vmatpush.msra.mxu2 %v122_v28 }
  0x20   :  { %107 = vmatpush.msra.mxu1 %v78_v15 }
  0x21   :  { %146 = vmatpush.msra.mxu2 %v121_v29 }
  0x22   :  { %108 = vmatpush.msra.mxu1 %v77_v16 }
  0x23   :  { %147 = vmatpush.msra.mxu2 %v120_v30 }
  0x24   :  { %109 = vmatpush.msra.mxu1 %v76_v17 }
  0x25   :  { %148 = vmatpush.msra.mxu2 %v119_v31 }
  0x26   :  { %110 = vmatpush.msra.mxu1 %v75_v18 }
  0x27   :  { %149 = vmatpush.msra.mxu2 %v118_v36 }
  0x29   :  { %150 = vmatpush.msra.mxu2 %v117_v37 }
  0x2b   :  { %151 = vmatpush.msra.mxu2 %v116_v38 }
  0x87   :  { %v71_v33 = vpop.f32.mrf.mxu0 }
  0x88   :  { %v72_v34 = vadd.f32 %v180_v32, %v71_v33 }
  0x8a   :  { %v74_v35 = vmax.f32 %v72_v34, 0.0 }
  0x8c   :  { %111 = vmatmul.f32.vlgmr.msra.gmra.mxu1 %v74_v35 }
 0x109   :  { %v112_v40 = vpop.f32.mrf.mxu1 }
 0x10a   :  { %v113_v41 = vadd.f32 %v181_v39, %v112_v40 }
 0x10c   :  { %v115_v42 = vmax.f32 %v113_v41, 0.0 }
 0x10e   :  { %152 = vmatmul.f32.vlgmr.msra.gmra.mxu2 %v115_v42 }
 0x191   :  { %v153_v44 = vpop.f32.mrf.mxu2 }
 0x192   :  { %v154_v45 = vadd.f32 %v182_v43, %v153_v44 }
 0x194   :  { %157 = vst.msk [vmem:[#allocation5] sm:$0xff] %vm156_vm1, %v154_v45 }
 0x195   :  { %168 = dma.vmem_to_hbm [thread:$0]  %s164_s26, 128, %s166_s29, [#allocation4]  }
 0x196   :  { %233 = dma.done.wait [#allocation4], 128  }
 0x197   :  { %234 = vsyncadd [#allocation4], 4294967168 }
 0x198   :  { %173 = vsyncpa [#allocation3], 1 }
 0x199   :  { %174 = vsyncpa [#allocation4], 1 }

</bundles_post_ra>
